<compile_context>
chip_gen: v7x
topology: tpu7x:2x2x1
jax: 0.10.0
libtpu: 0.0.40
codegen_flags: <defaults>
</compile_context>

<pallas_src>
import math
import functools

import jax
import jax.numpy as jnp
from jax.experimental import pallas as pl
from jax.experimental.pallas import tpu as pltpu


# ----------------------------------------------------------------------------
# PE table (matches the PyTorch buffer, stored as [maxlen, n_embd])
# ----------------------------------------------------------------------------
def make_pe_table(maxlen: int, n_embd: int, dtype=jnp.float32) -> jnp.ndarray:
    position = jnp.arange(maxlen, dtype=jnp.float32)[:, None]                # [L, 1]
    div_term = jnp.exp(jnp.arange(0, n_embd, 2, dtype=jnp.float32)
                       * (-math.log(10000.0) / n_embd))                      # [D/2]
    pe = jnp.zeros((maxlen, n_embd), dtype=jnp.float32)
    pe = pe.at[:, 0::2].set(jnp.sin(position * div_term))
    pe = pe.at[:, 1::2].set(jnp.cos(position * div_term))
    return pe.astype(dtype)


# ----------------------------------------------------------------------------
# Kernels
# ----------------------------------------------------------------------------
def _pe_add_kernel(x_ref, pe_ref, o_ref):
    # x_ref: (rt, ct); pe_ref: (1, ct) broadcast over rows.
    o_ref[...] = (x_ref[...] + pe_ref[...]).astype(o_ref.dtype)


def _pe_add_dropout_kernel(seed_ref, x_ref, pe_ref, o_ref, *,
                           drop_threshold: int, scale: float):
    y = x_ref[...] + pe_ref[...]
    # Deterministic per-tile stream. Note: the dropout mask is a function of
    # (seed, tiling); retiling changes the mask for a given seed.
    pltpu.prng_seed(seed_ref[0], pl.program_id(0), pl.program_id(1))
    bits = pltpu.bitcast(pltpu.prng_random_bits(y.shape), jnp.uint32)
    keep = bits >= jnp.uint32(drop_threshold)        # P(keep) = 1 - p
    o_ref[...] = jnp.where(keep, y * scale, 0.0).astype(o_ref.dtype)


# ----------------------------------------------------------------------------
# Tile selection
# ----------------------------------------------------------------------------
def _pick_tile(dim: int, align: int, max_tile: int) -> int:
    """Largest t that divides `dim`, is a multiple of `align` (or equals the
    full dim, which is always layout-legal), and is <= max_tile."""
    if dim <= max_tile:
        return dim
    divisors = [d for d in range(align, dim, align) if dim % d == 0]
    fitting = [d for d in divisors if d <= max_tile]
    if fitting:
        return max(fitting)
    if divisors:
        return min(divisors)     # nothing fits the budget; smallest legal tile
    return dim                   # no aligned divisor: fall back to full dim


def _choose_tiles(n_rows: int, n_cols: int, itemsize: int, budget_bytes: int):
    # Budget covers 2x double-buffered input tile + 2x output tile + pe tile.
    per_tile_budget = max(budget_bytes // 5, 8 * 128 * itemsize)
    rt_min = _pick_tile(n_rows, 8, 8)
    ct = _pick_tile(n_cols, 128, max(128, per_tile_budget // (rt_min * itemsize)))
    rt = _pick_tile(n_rows, 8, max(rt_min, per_tile_budget // (ct * itemsize)))
    return rt, ct


# ----------------------------------------------------------------------------
# Wrapper (forward pass of PositionalEncoding)
# ----------------------------------------------------------------------------
def positional_encoding(x: jnp.ndarray,
                        pe_table: jnp.ndarray,
                        *,
                        p: float = 0.1,
                        training: bool = False,
                        seed: int = 0,
                        vmem_budget_bytes: int = 32 * 1024 * 1024) -> jnp.ndarray:
    """x: [B, S, D]; pe_table: [maxlen, D]. Returns dropout(x + pe[:S])."""
    B, S, D = x.shape
    maxlen, d_pe = pe_table.shape
    assert d_pe == D and S <= maxlen

    # Lane-dense 2-D view: last dim S*D instead of D.
    C = S * D
    x2 = x.reshape(B, C)
    pe2 = pe_table[:S].astype(x.dtype).reshape(1, C)

    itemsize = jnp.dtype(x.dtype).itemsize
    rt, ct = _choose_tiles(B, C, itemsize, vmem_budget_bytes)
    grid = (B // rt, C // ct)

    cost = pl.CostEstimate(flops=B * C, transcendentals=0,
                           bytes_accessed=(2 * B * C + C) * itemsize)
    cparams = pltpu.CompilerParams(
        dimension_semantics=("parallel", "parallel"),
        vmem_limit_bytes=48 * 1024 * 1024,
    )
    out_shape = jax.ShapeDtypeStruct((B, C), x.dtype)

    if (not training) or p <= 0.0:
        out2 = pl.pallas_call(
            _pe_add_kernel,
            out_shape=out_shape,
            grid=grid,
            in_specs=[pl.BlockSpec((rt, ct), lambda i, j: (i, j)),
                      pl.BlockSpec((1, ct), lambda i, j: (0, j))],
            out_specs=pl.BlockSpec((rt, ct), lambda i, j: (i, j)),
            compiler_params=cparams,
            cost_estimate=cost,
        )(x2, pe2)
    else:
        drop_threshold = min(int(round(p * (1 << 32))), (1 << 32) - 1)
        scale = 1.0 / (1.0 - p)
        kernel = functools.partial(_pe_add_dropout_kernel,
                                   drop_threshold=drop_threshold, scale=scale)
        seed_arr = jnp.asarray([seed], dtype=jnp.int32)
        out2 = pl.pallas_call(
            kernel,
            out_shape=out_shape,
            grid_spec=pltpu.PrefetchScalarGridSpec(
                num_scalar_prefetch=1,
                grid=grid,
                in_specs=[pl.BlockSpec((rt, ct), lambda i, j, s: (i, j)),
                          pl.BlockSpec((1, ct), lambda i, j, s: (0, j))],
                out_specs=pl.BlockSpec((rt, ct), lambda i, j, s: (i, j)),
            ),
            compiler_params=cparams,
            cost_estimate=cost,
        )(seed_arr, x2, pe2)

    return out2.reshape(B, S, D)


# ----------------------------------------------------------------------------
# Demo / self-test
# ----------------------------------------------------------------------------
if __name__ == "__main__":
    # config: n_embd=32, pe_maxlen=64, pe_dropout=0.1
    B, S, D = 2, 8, 32
    MAXLEN = 64
    P_DROP = 0.1

    key = jax.random.PRNGKey(0)
    x = jax.random.normal(key, (B, S, D), dtype=jnp.float32)
    pe_table = make_pe_table(MAXLEN, D)

    # Eval-mode forward (dropout is identity), matches module.eval()
    out = positional_encoding(x, pe_table, p=P_DROP, training=False)
    out = jax.block_until_ready(out)

    ref = x + pe_table[:S][None, :, :]
    assert out.shape == (B, S, D)
    assert jnp.allclose(out, ref, atol=1e-6, rtol=1e-6), "mismatch vs reference"

    # Training (dropout) path uses the TPU hardware PRNG (pltpu.prng_seed),
    # which has no CPU/interpret lowering -> only exercise on a real TPU backend.
    if jax.default_backend() == "tpu":
        out_tr = positional_encoding(x, pe_table, p=P_DROP, training=True, seed=123)
        out_tr = jax.block_until_ready(out_tr)
        assert out_tr.shape == (B, S, D)
        scaled = ref / (1.0 - P_DROP)
        ok = jnp.isclose(out_tr, 0.0) | jnp.isclose(out_tr, scaled,
                                                    atol=1e-5, rtol=1e-5)
        assert bool(jnp.all(ok)), "training output not in {0, (x+pe)/(1-p)}"

    print("KERNEL_OK")
</pallas_src>

<mosaic_0001>
module attributes {stable_mosaic.version = 11 : i64} {
  func.func @_pe_add_kernel(%arg0: i32, %arg1: i32, %arg2: memref<2x256xf32, #tpu.memory_space<vmem>>, %arg3: memref<1x256xf32, #tpu.memory_space<vmem>>, %arg4: memref<2x256xf32, #tpu.memory_space<vmem>>) attributes {dimension_semantics = [#tpu.dimension_semantics<parallel>, #tpu.dimension_semantics<parallel>], iteration_bounds = array<i64: 1, 1>, scalar_prefetch = 0 : i64, scratch_operands = 0 : i64, tpu.core_type = #tpu.core_type<tc>, window_params = [{transform_indices = @transform_0, window_bounds = array<i64: 2, 256>}, {transform_indices = @transform_1, window_bounds = array<i64: 1, 256>}, {transform_indices = @transform_2, window_bounds = array<i64: 2, 256>}]} {
    %c0 = arith.constant 0 : index
    %c0_0 = arith.constant 0 : index
    %0 = vector.load %arg2[%c0, %c0_0] : memref<2x256xf32, #tpu.memory_space<vmem>>, vector<2x256xf32>
    %c0_1 = arith.constant 0 : index
    %c0_2 = arith.constant 0 : index
    %1 = vector.load %arg3[%c0_1, %c0_2] : memref<1x256xf32, #tpu.memory_space<vmem>>, vector<1x256xf32>
    %2 = vector.broadcast %1 : vector<1x256xf32> to vector<2x256xf32>
    %3 = arith.addf %0, %2 : vector<2x256xf32>
    %c0_3 = arith.constant 0 : index
    %c0_4 = arith.constant 0 : index
    %4 = vector.load %arg4[%c0_3, %c0_4] : memref<2x256xf32, #tpu.memory_space<vmem>>, vector<2x256xf32>
    tpu.vector_store %arg4[%c0_3, %c0_4], %3 {strides = array<i32>} : memref<2x256xf32, #tpu.memory_space<vmem>>, vector<2x256xf32>,
    return
  }
  func.func @transform_0(%arg0: i32, %arg1: i32) -> (i32, i32) {
    %c0_i32 = arith.constant 0 : i32
    return %arg0, %arg1 : i32, i32
  }
  func.func @transform_1(%arg0: i32, %arg1: i32) -> (i32, i32) {
    %c0_i32 = arith.constant 0 : i32
    %c0_i32_0 = arith.constant 0 : i32
    return %c0_i32, %arg1 : i32, i32
  }
  func.func @transform_2(%arg0: i32, %arg1: i32) -> (i32, i32) {
    %c0_i32 = arith.constant 0 : i32
    return %arg0, %arg1 : i32, i32
  }
}

</mosaic_0001>

<bundles_post_ra>
// kernel: tpu_custom_call.1
= control target key start
LH: loop header
LB: loop body
LE: loop exit
PB: predicated region body
PF: predicated region fallthrough
CT: control target
= control target key end

     0   :  { %7 = vsyncpa [#allocation3], 0  ;;  %s157_s0 = inlined_call_operand.hbm [shape: f32[2,256], index: 0, kind: input, shape index: {}]   ;;  %s158_s1 = inlined_call_operand.vmem [shape: f32[1,256], index: 1, kind: input, shape index: {}]   ;;  %s159_s2 = inlined_call_operand.hbm [shape: f32[2,256], index: 2, kind: output, shape index: {}]  }
   0x1   :  { %8 = vsyncpa [#allocation4], 0  ;;  %s112_s9 = smov [#allocation2]   ;;  %s64_s13 = scalar_lea.hbm %s157_s0, 64 }
   0x2   :  { %s15_s10 = sshll.u32 %s112_s9, 4  ;;  %p65_p0 = scmp.ne.s32.totalorder %s157_s0, %s64_s13  ;;  %s16_s10 = int_to_ptr.vmem [resolvable:$true] %s15_s10 }
   0x3   :  { %p68_p1 = scmp.lt.u32.totalorder %s64_s13, %s157_s0 }
   0x5   :  { %p70_p2 = pnand %p68_p1, %p65_p0 }
   0x7   :  { %73 = shalt.err (!%p70_p2)
}
   0x8   :  { %s74_s18 = scalar_lea.vmem %s16_s10, 64  ;;  %p79_p4 = scmp.lt.s32.totalorder %s16_s10, %s16_s10 }
   0x9   :  { %p75_p3 = scmp.ne.s32.totalorder %s16_s10, %s74_s18  ;;  %p80_p5 = scmp.lt.s32.totalorder %s74_s18, %s74_s18 }
   0xb   :  { %p81_p6 = por %p80_p5, %p79_p4 }
   0xd   :  { %p82_p7 = pnand %p81_p6, %p75_p3 }
   0xf   :  { %85 = shalt.err (!%p82_p7)
}
  0x10   :  { %18 = dma.hbm_to_vmem [thread:$0]  %s157_s0, 64, %s16_s10, [#allocation3]  }
  0x11   :  { %108 = dma.done.wait [#allocation3], 64  }
  0x12   :  { %109 = vsyncadd [#allocation3], 4294967232  ;;  %v27_v0 = vlaneseq  ;;  %v113_v1 = vmov 1983009808   ;;  %v25_v7 = vld [vmem:[%s158_s1] sm:$0x3] }
  0x13   :  { %v37_v2 = vunpack.c.l.s4 %v113_v1  ;;  %v24_v12 = vld [vmem:[#allocation2] sm:$0xf]  ;;  %s114_s23 = smov [#allocation5]  }
  0x14   :  { %v28_v3 = vshrl.u32 %v27_v0, 7  ;;  %s52_s0 = sshll.u32 %s114_s23, 4  ;;  %s53_s0 = int_to_ptr.vmem [resolvable:$true] %s52_s0 }
  0x15   :  { %v38_v6 = vunpack.c.0.s8 %v37_v2  ;;  %s86_s24 = scalar_lea.vmem %s53_s0, 64  ;;  %p91_p9 = scmp.lt.s32.totalorder %s53_s0, %s53_s0 }
  0x16   :  { %v29_v4 = vsub.s32 0, %v28_v3  ;;  %v33_v5 = vsub.s32 1, %v28_v3  ;;  %p87_p8 = scmp.ne.s32.totalorder %s53_s0, %s86_s24  ;;  %p92_p10 = scmp.lt.s32.totalorder %s86_s24, %s86_s24 }
  0x17   :  { %v41_v10 = vsub.s32 %v38_v6, %v28_v3 }
  0x18   :  { %v30_v8 = vrot.slane %v25_v7, %v29_v4  ;;  %v34_v9 = vrot.slane %v25_v7, %v33_v5  ;;  %p93_p11 = por %p92_p10, %p91_p9 }
  0x1a   :  { %v35_v11 = vcombine.low %v30_v8, %v34_v9  ;;  %p94_p12 = pnand %p93_p11, %p87_p8 }
  0x1c   :  { %v42_v13 = vrot.slane %v35_v11, %v41_v10 }
  0x1e   :  { %v44_v14 = vadd.f32 %v42_v13, %v24_v12 }
  0x20   :  { %45 = vst [vmem:[#allocation5] sm:$0xf] %v44_v14 }
  0x21   :  { %97 = shalt.err (!%p94_p12)
}
  0x22   :  { %s98_s26 = scalar_lea.hbm %s159_s2, 64 }
  0x23   :  { %p99_p13 = scmp.ne.s32.totalorder %s159_s2, %s98_s26  ;;  %p102_p0 = scmp.lt.u32.totalorder %s98_s26, %s159_s2 }
  0x25   :  { %p104_p1 = pnand %p102_p0, %p99_p13 }
  0x27   :  { %107 = shalt.err (!%p104_p1)
}
  0x28   :  { %55 = dma.vmem_to_hbm [thread:$0]  %s53_s0, 64, %s159_s2, [#allocation4]  }
  0x29   :  { %110 = dma.done.wait [#allocation4], 64  }
  0x2a   :  { %111 = vsyncadd [#allocation4], 4294967232 }
  0x2b   :  { %59 = vsyncpa [#allocation3], 1 }
  0x2c   :  { %60 = vsyncpa [#allocation4], 1 }

</bundles_post_ra>
